<compile_context>
chip_gen: v7x
topology: tpu7x:2x2x1
jax: 0.10.0
libtpu: 0.0.40
codegen_flags: <defaults>
</compile_context>

<pallas_src>
import functools
import math

import jax
import jax.numpy as jnp
from jax.experimental import pallas as pl
from jax.experimental.pallas import tpu as pltpu


_LANE = 128                 # TPU lane width
_MAX_LANE_BLOCK = 2048      # lanes per tile (multiple of 128)
_MAX_BLOCK_ELEMS = 1 << 20  # ~4 MiB of f32 per input block (double-buffered)


def _hard_min_kernel(x_ref, o_ref):
    """Hard min over the (small) reduction axis of a (M, L) tile."""
    o_ref[...] = jnp.min(x_ref[...], axis=0, keepdims=True)


def _soft_min_kernel(x_ref, o_ref, *, scale):
    """Numerically-stable softmin over the reduction axis of a (M, L) tile."""
    x = x_ref[...].astype(jnp.float32)
    s = x * (-scale)                                 # scale baked in (f32 constant)
    m = jnp.max(s, axis=0, keepdims=True)            # stability shift
    e = jnp.exp(s - m)
    num = jnp.sum(e * x, axis=0, keepdims=True)
    den = jnp.sum(e, axis=0, keepdims=True)
    o_ref[...] = (num / den).astype(o_ref.dtype)


def minish_forward(x, scale=0.0, dim=1):
    """JAX/Pallas equivalent of Minish().forward(x, scale, dim).

    Returns min/softmin of `x` along `dim` with keepdim=True.
    """
    scale = float(scale)
    x = jnp.asarray(x)
    ndim = x.ndim
    dim = dim % ndim

    # Move reduction axis to the front; flatten the remaining axes lane-dense.
    xt = jnp.moveaxis(x, dim, 0)
    M = xt.shape[0]
    rest_shape = xt.shape[1:]
    N = int(math.prod(rest_shape)) if rest_shape else 1
    x2 = xt.reshape(M, N)

    # Lane-dense padding: pad the flattened axis up to a multiple of 128.
    n_pad = (-N) % _LANE
    if n_pad:
        x2 = jnp.pad(x2, ((0, 0), (0, n_pad)))
    Np = N + n_pad

    # Lane tile: as wide as possible (multiple of 128), capped so the
    # (M, lane_block) input block stays well under the scoped-VMEM budget
    # even after double-buffering (works on v5e 16 MiB / v7x 32 MiB defaults).
    budget = max(_LANE, ((_MAX_BLOCK_ELEMS // max(M, 1)) // _LANE) * _LANE)
    lane_block = min(Np, _MAX_LANE_BLOCK, budget)
    grid = (pl.cdiv(Np, lane_block),)

    # Specialize on scale at trace time: emit only the branch we need.
    if scale > 0:
        kernel = functools.partial(_soft_min_kernel, scale=scale)
    else:
        kernel = _hard_min_kernel

    # TODO(synk): the reduction axis M is kept whole per tile (fine for STL
    # usage where M is 2 or time_dim); extremely large M would need an extra
    # "arbitrary" grid axis with a pl.when-guarded running min / softmin.
    out2 = pl.pallas_call(
        kernel,
        out_shape=jax.ShapeDtypeStruct((1, Np), x.dtype),
        grid=grid,
        in_specs=[pl.BlockSpec((M, lane_block), lambda i: (0, i))],
        out_specs=pl.BlockSpec((1, lane_block), lambda i: (0, i)),
        compiler_params=pltpu.CompilerParams(
            dimension_semantics=("parallel",)),
    )(x2)

    out = out2[:, :N].reshape((1,) + rest_shape)
    return jnp.moveaxis(out, 0, dim)


def and_forward(trace1, trace2, scale=0.0):
    """STL `And` forward: Minish(stack([t1, t2], -1), scale, dim=-1).squeeze(-1).

    traces: [batch, time, x_dim]. After stacking, the reduction axis has
    extent 2 and the flattened lane axis is batch*time*x_dim (lane-dense).
    """
    xx = jnp.stack([trace1, trace2], axis=-1)
    return minish_forward(xx, scale, dim=-1)[..., 0]


def _minish_reference(x, scale=0.0, dim=1):
    """Pure-JAX reference mirroring the PyTorch Minish code path exactly."""
    if scale > 0:
        w = jax.nn.softmax(-x * scale, axis=dim)
        return jnp.sum(w * x, axis=dim, keepdims=True)
    return jnp.min(x, axis=dim, keepdims=True)


if __name__ == "__main__":
    key = jax.random.PRNGKey(0)
    k1, k2, k3 = jax.random.split(key, 3)

    # Minish directly: x is [batch_size, max_dim, x_dim], reduce over dim=1.
    B, M, X = 2, 8, 32
    x = jax.random.normal(k1, (B, M, X), dtype=jnp.float32)

    out_hard = minish_forward(x, scale=0.0, dim=1)
    jax.block_until_ready(out_hard)
    ref_hard = _minish_reference(x, scale=0.0, dim=1)
    assert out_hard.shape == (B, 1, X)
    assert jnp.allclose(out_hard, ref_hard, atol=1e-6, rtol=1e-6)

    out_soft = minish_forward(x, scale=3.0, dim=1)
    jax.block_until_ready(out_soft)
    ref_soft = _minish_reference(x, scale=3.0, dim=1)
    assert jnp.allclose(out_soft, ref_soft, atol=1e-5, rtol=1e-5)

    # And-formula usage: pairwise min / smooth-min of two traces (dim=-1).
    T = 8
    t1 = jax.random.normal(k2, (B, T, X), dtype=jnp.float32)
    t2 = jax.random.normal(k3, (B, T, X), dtype=jnp.float32)

    out_pair_hard = and_forward(t1, t2, scale=0.0)
    jax.block_until_ready(out_pair_hard)
    assert out_pair_hard.shape == (B, T, X)
    assert jnp.allclose(out_pair_hard, jnp.minimum(t1, t2), atol=1e-6, rtol=1e-6)

    out_pair_soft = and_forward(t1, t2, scale=2.0)
    jax.block_until_ready(out_pair_soft)
    xx = jnp.stack([t1, t2], axis=-1)
    ref_pair_soft = _minish_reference(xx, scale=2.0, dim=-1)[..., 0]
    assert jnp.allclose(out_pair_soft, ref_pair_soft, atol=1e-5, rtol=1e-5)

    print("KERNEL_OK")
</pallas_src>

<mosaic_0001>
module attributes {stable_mosaic.version = 11 : i64} {
  func.func @_hard_min_kernel(%arg0: i32, %arg1: memref<8x128xf32, #tpu.memory_space<vmem>>, %arg2: memref<1x128xf32, #tpu.memory_space<vmem>>) attributes {dimension_semantics = [#tpu.dimension_semantics<parallel>], iteration_bounds = array<i64: 1>, scalar_prefetch = 0 : i64, scratch_operands = 0 : i64, tpu.core_type = #tpu.core_type<tc>, window_params = [{transform_indices = @transform_0, window_bounds = array<i64: 8, 128>}, {transform_indices = @transform_1, window_bounds = array<i64: 1, 128>}]} {
    %c0 = arith.constant 0 : index
    %c0_0 = arith.constant 0 : index
    %0 = vector.load %arg1[%c0, %c0_0] : memref<8x128xf32, #tpu.memory_space<vmem>>, vector<8x128xf32>
    %cst = arith.constant dense<0x7F800000> : vector<128xf32>
    %1 = vector.multi_reduction <minimumf>, %0, %cst [0] : vector<8x128xf32> to vector<128xf32>
    %2 = vector.shape_cast %1 : vector<128xf32> to vector<1x128xf32>
    %c0_1 = arith.constant 0 : index
    %c0_2 = arith.constant 0 : index
    %3 = vector.load %arg2[%c0_1, %c0_2] : memref<1x128xf32, #tpu.memory_space<vmem>>, vector<1x128xf32>
    tpu.vector_store %arg2[%c0_1, %c0_2], %2 {strides = array<i32>} : memref<1x128xf32, #tpu.memory_space<vmem>>, vector<1x128xf32>,
    return
  }
  func.func @transform_0(%arg0: i32) -> (i32, i32) {
    %c0_i32 = arith.constant 0 : i32
    %c0_i32_0 = arith.constant 0 : i32
    return %c0_i32, %arg0 : i32, i32
  }
  func.func @transform_1(%arg0: i32) -> (i32, i32) {
    %c0_i32 = arith.constant 0 : i32
    %c0_i32_0 = arith.constant 0 : i32
    return %c0_i32, %arg0 : i32, i32
  }
}

</mosaic_0001>

<bundles_post_ra>
// kernel: tpu_custom_call.1
= control target key start
LH: loop header
LB: loop body
LE: loop exit
PB: predicated region body
PF: predicated region fallthrough
CT: control target
= control target key end

     0   :  { %6 = vsyncpa [#allocation3], 0  ;;  %s130_s0 = inlined_call_operand.hbm [shape: f32[8,128], index: 0, kind: input, shape index: {}]   ;;  %s131_s1 = inlined_call_operand.hbm [shape: f32[1,128], index: 1, kind: output, shape index: {}]  }
   0x1   :  { %7 = vsyncpa [#allocation4], 0  ;;  %s94_s6 = smov [#allocation2]   ;;  %s46_s10 = scalar_lea.hbm %s130_s0, 128 }
   0x2   :  { %s14_s7 = sshll.u32 %s94_s6, 4  ;;  %p47_p0 = scmp.ne.s32.totalorder %s130_s0, %s46_s10  ;;  %s15_s7 = int_to_ptr.vmem [resolvable:$true] %s14_s7 }
   0x3   :  { %p50_p1 = scmp.lt.u32.totalorder %s46_s10, %s130_s0 }
   0x5   :  { %p52_p2 = pnand %p50_p1, %p47_p0 }
   0x7   :  { %55 = shalt.err (!%p52_p2)
}
   0x8   :  { %s56_s15 = scalar_lea.vmem %s15_s7, 128  ;;  %p61_p4 = scmp.lt.s32.totalorder %s15_s7, %s15_s7 }
   0x9   :  { %p57_p3 = scmp.ne.s32.totalorder %s15_s7, %s56_s15  ;;  %p62_p5 = scmp.lt.s32.totalorder %s56_s15, %s56_s15 }
   0xb   :  { %p63_p6 = por %p62_p5, %p61_p4 }
   0xd   :  { %p64_p7 = pnand %p63_p6, %p57_p3 }
   0xf   :  { %67 = shalt.err (!%p64_p7)
}
  0x10   :  { %17 = dma.hbm_to_vmem [thread:$0]  %s130_s0, 128, %s15_s7, [#allocation3]  }
  0x11   :  { %90 = dma.done.wait [#allocation3], 128  }
  0x12   :  { %91 = vsyncadd [#allocation3], 4294967168  ;;  %v21_v0 = vld [vmem:[#allocation2] sm:$0xff]  ;;  %s95_s18 = smov [#allocation5]  }
  0x13   :  { %v22_v1 = vrot.slane %v21_v0, 4  ;;  %s35_s19 = sshll.u32 %s95_s18, 4  ;;  %s36_s19 = int_to_ptr.vmem [resolvable:$true] %s35_s19 }
  0x14   :  { %s68_s20 = scalar_lea.vmem %s36_s19, 16  ;;  %s72_s21 = scalar_lea.vmem %s36_s19, 32 }
  0x15   :  { %v23_v2 = vmin.f32 %v21_v0, %v22_v1  ;;  %p69_p8 = scmp.ne.s32.totalorder %s36_s19, %s68_s20  ;;  %p73_p9 = scmp.lt.s32.totalorder %s36_s19, %s36_s19 }
  0x16   :  { %p74_p10 = scmp.lt.s32.totalorder %s72_s21, %s68_s20 }
  0x17   :  { %v24_v3 = vrot.slane %v23_v2, 2 }
  0x18   :  { %p75_p11 = por %p74_p10, %p73_p9 }
  0x19   :  { %v25_v4 = vmin.f32 %v23_v2, %v24_v3 }
  0x1a   :  { %p76_p12 = pnand %p75_p11, %p69_p8 }
  0x1b   :  { %v26_v5 = vrot.slane %v25_v4, 1 }
  0x1d   :  { %v27_v6 = vmin.f32 %v25_v4, %v26_v5 }
  0x1f   :  { %28 = vst [vmem:[#allocation5] sm:$0x1] %v27_v6 }
  0x20   :  { %79 = shalt.err (!%p76_p12)
}
  0x21   :  { %s80_s23 = scalar_lea.hbm %s131_s1, 16 }
  0x22   :  { %p81_p13 = scmp.ne.s32.totalorder %s131_s1, %s80_s23  ;;  %p84_p0 = scmp.lt.u32.totalorder %s80_s23, %s131_s1 }
  0x24   :  { %p86_p1 = pnand %p84_p0, %p81_p13 }
  0x26   :  { %89 = shalt.err (!%p86_p1)
}
  0x27   :  { %38 = dma.vmem_to_hbm [thread:$0]  %s36_s19, 16, %s131_s1, [#allocation4]  }
  0x28   :  { %92 = dma.done.wait [#allocation4], 16  }
  0x29   :  { %93 = vsyncadd [#allocation4], 4294967280 }
  0x2a   :  { %42 = vsyncpa [#allocation3], 1 }
  0x2b   :  { %43 = vsyncpa [#allocation4], 1 }

</bundles_post_ra>
